<compile_context>
chip_gen: v6e
topology: v6e:2x2x1
jax: 0.10.0
libtpu: 0.0.40
codegen_flags: <defaults>
</compile_context>

<pallas_src>
import functools

import jax
import jax.numpy as jnp
from jax.experimental import pallas as pl
from jax.experimental.pallas import tpu as pltpu


def _round_up(x, m):
    return ((x + m - 1) // m) * m


# ---------------------------------------------------------------------------
# Kernels.  Grid = (row tiles, hidden tiles); hidden is the inner ("arbitrary")
# reduction axis.  SwiGLU is elementwise along hidden, so tiling hidden and
# accumulating the partial down-projections is exact.
# ---------------------------------------------------------------------------
def _swiglu_partial(x, w13_ref, w2_ref):
    # Gate / up projections for this hidden tile (f32 MXU accumulation).
    g = jnp.dot(x, w13_ref[0], preferred_element_type=jnp.float32)   # (tm, tn) f32
    u = jnp.dot(x, w13_ref[1], preferred_element_type=jnp.float32)   # (tm, tn) f32
    h = (g * jax.nn.sigmoid(g) * u).astype(w2_ref.dtype)             # silu(g)*u -> bf16
    # Partial down-projection for this hidden tile.
    return jnp.dot(h, w2_ref[...], preferred_element_type=jnp.float32)


def _ffn_kernel_f32_out(x_ref, w13_ref, w2_ref, o_ref):
    """f32 output: accumulate directly into the (VMEM-resident) output block."""
    j = pl.program_id(1)

    @pl.when(j == 0)
    def _():
        o_ref[...] = jnp.zeros_like(o_ref)

    o_ref[...] += _swiglu_partial(x_ref[...], w13_ref, w2_ref)


def _ffn_kernel_acc(x_ref, w13_ref, w2_ref, o_ref, acc_ref):
    """Non-f32 output: accumulate in f32 scratch, cast once on the last hidden tile."""
    j = pl.program_id(1)

    @pl.when(j == 0)
    def _():
        acc_ref[...] = jnp.zeros_like(acc_ref)

    acc_ref[...] += _swiglu_partial(x_ref[...], w13_ref, w2_ref)

    @pl.when(j == pl.num_programs(1) - 1)
    def _():
        o_ref[...] = acc_ref[...].astype(o_ref.dtype)


# ---------------------------------------------------------------------------
# Per-generation configuration (row tile, hidden tile, VMEM limit).
# Weights re-stream once per row tile, so tm must reach the compute-bound
# threshold (~peak_flops / HBM_BW rows):  v5e ~240, v6e ~680, v7x ~310/TC.
# ---------------------------------------------------------------------------
def ffn_config(device_kind=None):
    if device_kind is None:
        device_kind = jax.devices()[0].device_kind
    k = device_kind.lower()
    if "v7" in k:
        # 64 MiB VMEM, 3.2 TB/s HBM, 2 TCs: small tn, modest tm, split rows for megacore.
        return dict(tm=384, tn=256, vmem_limit_bytes=56 * 1024 * 1024,
                    split_rows_for_megacore=True)
    if "v6" in k:
        return dict(tm=768, tn=512, vmem_limit_bytes=100 * 1024 * 1024,
                    split_rows_for_megacore=False)
    if "v5" in k:
        return dict(tm=512, tn=512, vmem_limit_bytes=100 * 1024 * 1024,
                    split_rows_for_megacore=False)
    # Unknown / older generation: conservative.
    return dict(tm=256, tn=256, vmem_limit_bytes=48 * 1024 * 1024,
                split_rows_for_megacore=False)


def prepare_ffn_params(w1, w3, w2, *, tn):
    """One-time (init) param prep: bf16 cast, hidden padding, w1/w3 stacking.

    Hoisted out of the forward path so the f32->bf16 weight cast is not re-done
    (and re-written to HBM) on every call.
    """
    dim, hidden = w1.shape
    tn_eff = min(tn, _round_up(hidden, 128))
    hp = _round_up(hidden, tn_eff)

    w1b = w1.astype(jnp.bfloat16)
    w3b = w3.astype(jnp.bfloat16)
    w2b = w2.astype(jnp.bfloat16)
    if hp != hidden:
        # Zero-padded hidden columns contribute silu(0)*0 = 0 -> exact.
        w1b = jnp.pad(w1b, ((0, 0), (0, hp - hidden)))
        w3b = jnp.pad(w3b, ((0, 0), (0, hp - hidden)))
        w2b = jnp.pad(w2b, ((0, hp - hidden), (0, 0)))

    w13 = jnp.stack([w1b, w3b], axis=0)          # (2, dim, hp): one DMA stream
    return w13, w2b, tn_eff


@functools.partial(
    jax.jit,
    static_argnames=("tm", "tn", "vmem_limit_bytes", "split_rows_for_megacore"))
def feed_forward(x, w13, w2, *, tm=512, tn=512,
                 vmem_limit_bytes=100 * 1024 * 1024,
                 split_rows_for_megacore=False):
    """x: (..., dim); w13: (2, dim, hidden_padded) bf16; w2: (hidden_padded, dim) bf16."""
    *lead, dim = x.shape
    hp = w2.shape[0]
    out_dtype = x.dtype

    M = 1
    for d in lead:
        M *= d

    # ---- row tile selection -------------------------------------------------
    if M <= 128:
        # Decode / tiny batch: pad only to the bf16 sublane pack (16), not 128.
        tm_eff = _round_up(max(M, 16), 16)
        mp = tm_eff
    elif M <= tm:
        if split_rows_for_megacore and M > 256:
            # v7x: make sure both TensorCores get a row tile.
            tm_eff = _round_up(-(-M // 2), 128)
            mp = 2 * tm_eff
        else:
            tm_eff = _round_up(M, 128)
            mp = tm_eff
    else:
        tm_eff = tm
        mp = _round_up(M, tm_eff)

    # ---- hidden tile selection (hp is already padded to a 128 multiple) ------
    tn_eff = min(tn, hp)
    while hp % tn_eff != 0 and tn_eff > 128:
        tn_eff //= 2
    if hp % tn_eff != 0:
        tn_eff = hp

    # ---- inputs: bf16 activations, zero-pad rows up to mp --------------------
    x2d = x.reshape(M, dim).astype(jnp.bfloat16)
    if mp != M:
        x2d = jnp.pad(x2d, ((0, mp - M), (0, 0)))   # zero rows -> zero outputs, sliced off

    grid = (mp // tm_eff, hp // tn_eff)
    n_row_tiles = grid[0]

    # Weight traffic repeats once per row tile (hidden is the inner axis).
    bytes_accessed = (
        x2d.size * 2
        + (w13.size + w2.size) * 2 * n_row_tiles
        + mp * dim * jnp.dtype(out_dtype).itemsize
    )
    cost = pl.CostEstimate(
        flops=6 * mp * dim * hp,      # three (M, dim, hidden)-sized matmuls
        transcendentals=mp * hp,      # sigmoid
        bytes_accessed=bytes_accessed,
    )

    in_specs = [
        pl.BlockSpec((tm_eff, dim), lambda i, j: (i, 0)),        # x rows (reused over j)
        pl.BlockSpec((2, dim, tn_eff), lambda i, j: (0, 0, j)),  # stacked w1/w3 tile
        pl.BlockSpec((tn_eff, dim), lambda i, j: (j, 0)),        # w2 tile
    ]
    out_spec = pl.BlockSpec((tm_eff, dim), lambda i, j: (i, 0))

    if out_dtype == jnp.float32:
        kernel = _ffn_kernel_f32_out
        scratch_shapes = []            # accumulate directly into the output block
    else:
        kernel = _ffn_kernel_acc
        scratch_shapes = [pltpu.VMEM((tm_eff, dim), jnp.float32)]

    out2d = pl.pallas_call(
        kernel,
        out_shape=jax.ShapeDtypeStruct((mp, dim), out_dtype),
        grid_spec=pltpu.PrefetchScalarGridSpec(
            num_scalar_prefetch=0,
            grid=grid,
            in_specs=in_specs,
            out_specs=out_spec,
            scratch_shapes=scratch_shapes,
        ),
        compiler_params=pltpu.CompilerParams(
            dimension_semantics=("parallel", "arbitrary"),
            vmem_limit_bytes=vmem_limit_bytes,
        ),
        cost_estimate=cost,
    )(x2d, w13, w2)

    return out2d[:M].reshape(*lead, dim)


def _reference_bf16(x, w1, w3, w2):
    """Pure-JAX reference with the same bf16 operands / f32 accumulation."""
    dim = x.shape[-1]
    xb = x.reshape(-1, dim).astype(jnp.bfloat16)
    g = jnp.dot(xb, w1.astype(jnp.bfloat16), preferred_element_type=jnp.float32)
    g = g * jax.nn.sigmoid(g)
    u = jnp.dot(xb, w3.astype(jnp.bfloat16), preferred_element_type=jnp.float32)
    h = (g * u).astype(jnp.bfloat16)
    o = jnp.dot(h, w2.astype(jnp.bfloat16), preferred_element_type=jnp.float32)
    return o.reshape(x.shape).astype(x.dtype)


if __name__ == "__main__":
    # ModelArgs defaults: dim=512, multiple_of=256 -> hidden = 256*ceil(1365/256) = 1536
    dim = 512
    multiple_of = 256
    hidden = int(8 * dim / 3)
    hidden = multiple_of * ((hidden + multiple_of - 1) // multiple_of)

    batch, seq = 2, 8

    key = jax.random.PRNGKey(0)
    kx, k1, k3, k2 = jax.random.split(key, 4)
    x = jax.random.normal(kx, (batch, seq, dim), dtype=jnp.float32)
    # torch Linear stores (out, in); we keep the math-equivalent transposed (in, out) layout.
    w1 = jax.random.normal(k1, (dim, hidden), dtype=jnp.float32) * (1.0 / dim ** 0.5)
    w3 = jax.random.normal(k3, (dim, hidden), dtype=jnp.float32) * (1.0 / dim ** 0.5)
    w2 = jax.random.normal(k2, (hidden, dim), dtype=jnp.float32) * (1.0 / hidden ** 0.5)

    cfg = ffn_config()
    # One-time param preparation (init-time cast / pad / stack), hoisted out of the call.
    w13, w2b, tn_eff = prepare_ffn_params(w1, w3, w2, tn=cfg["tn"])

    out = feed_forward(
        x, w13, w2b,
        tm=cfg["tm"], tn=tn_eff,
        vmem_limit_bytes=cfg["vmem_limit_bytes"],
        split_rows_for_megacore=cfg["split_rows_for_megacore"],
    )
    out = jax.block_until_ready(out)

    ref = _reference_bf16(x, w1, w3, w2)
    assert out.shape == (batch, seq, dim)
    err = jnp.max(jnp.abs(out - ref))
    assert jnp.allclose(out, ref, atol=1e-2, rtol=1e-2), f"mismatch vs reference, max abs err {err}"

    print("KERNEL_OK")
</pallas_src>

<mosaic_0001>
module attributes {stable_mosaic.version = 11 : i64} {
  func.func @_ffn_kernel_f32_out(%arg0: i32, %arg1: i32, %arg2: memref<16x512xbf16, #tpu.memory_space<vmem>>, %arg3: memref<2x512x256xbf16, #tpu.memory_space<vmem>>, %arg4: memref<256x512xbf16, #tpu.memory_space<vmem>>, %arg5: memref<16x512xf32, #tpu.memory_space<vmem>>) attributes {dimension_semantics = [#tpu.dimension_semantics<parallel>, #tpu.dimension_semantics<arbitrary>], iteration_bounds = array<i64: 1, 6>, scalar_prefetch = 0 : i64, scratch_operands = 0 : i64, tpu.core_type = #tpu.core_type<tc>, window_params = [{transform_indices = @transform_0, window_bounds = array<i64: 16, 512>}, {transform_indices = @transform_1, window_bounds = array<i64: 2, 512, 256>}, {transform_indices = @transform_2, window_bounds = array<i64: 256, 512>}, {transform_indices = @transform_3, window_bounds = array<i64: 16, 512>}]} {
    %c0_i32 = arith.constant 0 : i32
    %0 = arith.cmpi eq, %arg1, %c0_i32 : i32
    %1 = arith.extui %0 : i1 to i32
    %c0_i32_0 = arith.constant 0 : i32
    %2 = arith.cmpi ne, %1, %c0_i32_0 : i32
    scf.if %2 {
      %cst_16 = arith.constant 0.000000e+00 : f32
      %23 = vector.broadcast %cst_16 : f32 to vector<16x512xf32>
      %c0_17 = arith.constant 0 : index
      %c0_18 = arith.constant 0 : index
      %24 = vector.load %arg5[%c0_17, %c0_18] : memref<16x512xf32, #tpu.memory_space<vmem>>, vector<16x512xf32>
      tpu.vector_store %arg5[%c0_17, %c0_18], %23 {strides = array<i32>} : memref<16x512xf32, #tpu.memory_space<vmem>>, vector<16x512xf32>,
    } else {
    }
    %c0 = arith.constant 0 : index
    %c0_1 = arith.constant 0 : index
    %3 = vector.load %arg5[%c0, %c0_1] : memref<16x512xf32, #tpu.memory_space<vmem>>, vector<16x512xf32>
    %c0_2 = arith.constant 0 : index
    %c0_3 = arith.constant 0 : index
    %4 = vector.load %arg2[%c0_2, %c0_3] : memref<16x512xbf16, #tpu.memory_space<vmem>>, vector<16x512xbf16>
    %c0_4 = arith.constant 0 : index
    %c0_5 = arith.constant 0 : index
    %c0_6 = arith.constant 0 : index
    %5 = vector.load %arg3[%c0_4, %c0_5, %c0_6] : memref<2x512x256xbf16, #tpu.memory_space<vmem>>, vector<1x512x256xbf16>
    %6 = vector.shape_cast %5 : vector<1x512x256xbf16> to vector<512x256xbf16>
    %cst = arith.constant dense<0.000000e+00> : vector<16x256xf32>
    %7 = tpu.matmul %4, %6, %cst {dimension_numbers = #tpu.dot_dimension_numbers<[1], [0], [0], [1], [0, 0, 1, 1], [], []>} : vector<16x512xbf16>, vector<512x256xbf16>, vector<16x256xf32> -> vector<16x256xf32>
    %c1 = arith.constant 1 : index
    %c0_7 = arith.constant 0 : index
    %c0_8 = arith.constant 0 : index
    %8 = vector.load %arg3[%c1, %c0_7, %c0_8] : memref<2x512x256xbf16, #tpu.memory_space<vmem>>, vector<1x512x256xbf16>
    %9 = vector.shape_cast %8 : vector<1x512x256xbf16> to vector<512x256xbf16>
    %cst_9 = arith.constant dense<0.000000e+00> : vector<16x256xf32>
    %10 = tpu.matmul %4, %9, %cst_9 {dimension_numbers = #tpu.dot_dimension_numbers<[1], [0], [0], [1], [0, 0, 1, 1], [], []>} : vector<16x512xbf16>, vector<512x256xbf16>, vector<16x256xf32> -> vector<16x256xf32>
    %11 = arith.negf %7 : vector<16x256xf32>
    %12 = math.exp %11 : vector<16x256xf32>
    %cst_10 = arith.constant 1.000000e+00 : f32
    %13 = vector.broadcast %cst_10 : f32 to vector<16x256xf32>
    %14 = arith.addf %13, %12 : vector<16x256xf32>
    %15 = arith.divf %13, %14 : vector<16x256xf32>
    %16 = arith.mulf %7, %15 : vector<16x256xf32>
    %17 = arith.mulf %16, %10 : vector<16x256xf32>
    %18 = arith.truncf %17 : vector<16x256xf32> to vector<16x256xbf16>
    %c0_11 = arith.constant 0 : index
    %c0_12 = arith.constant 0 : index
    %19 = vector.load %arg4[%c0_11, %c0_12] : memref<256x512xbf16, #tpu.memory_space<vmem>>, vector<256x512xbf16>
    %cst_13 = arith.constant dense<0.000000e+00> : vector<16x512xf32>
    %20 = tpu.matmul %18, %19, %cst_13 {dimension_numbers = #tpu.dot_dimension_numbers<[1], [0], [0], [1], [0, 0, 1, 1], [], []>} : vector<16x256xbf16>, vector<256x512xbf16>, vector<16x512xf32> -> vector<16x512xf32>
    %21 = arith.addf %3, %20 : vector<16x512xf32>
    %c0_14 = arith.constant 0 : index
    %c0_15 = arith.constant 0 : index
    %22 = vector.load %arg5[%c0_14, %c0_15] : memref<16x512xf32, #tpu.memory_space<vmem>>, vector<16x512xf32>
    tpu.vector_store %arg5[%c0_14, %c0_15], %21 {strides = array<i32>} : memref<16x512xf32, #tpu.memory_space<vmem>>, vector<16x512xf32>,
    return
  }
  func.func @transform_0(%arg0: i32, %arg1: i32) -> (i32, i32) {
    %c0_i32 = arith.constant 0 : i32
    %c0_i32_0 = arith.constant 0 : i32
    return %arg0, %c0_i32 : i32, i32
  }
  func.func @transform_1(%arg0: i32, %arg1: i32) -> (i32, i32, i32) {
    %c0_i32 = arith.constant 0 : i32
    %c0_i32_0 = arith.constant 0 : i32
    %c0_i32_1 = arith.constant 0 : i32
    return %c0_i32, %c0_i32_0, %arg1 : i32, i32, i32
  }
  func.func @transform_2(%arg0: i32, %arg1: i32) -> (i32, i32) {
    %c0_i32 = arith.constant 0 : i32
    %c0_i32_0 = arith.constant 0 : i32
    return %arg1, %c0_i32 : i32, i32
  }
  func.func @transform_3(%arg0: i32, %arg1: i32) -> (i32, i32) {
    %c0_i32 = arith.constant 0 : i32
    %c0_i32_0 = arith.constant 0 : i32
    return %arg0, %c0_i32 : i32, i32
  }
}

</mosaic_0001>

<bundles_post_ra>
// kernel: feed_forward.1
= control target key start
LH: loop header
LB: loop body
LE: loop exit
PB: predicated region body
PF: predicated region fallthrough
CT: control target
= control target key end

     0   :  { %8 = vsyncpa [#allocation3], 0  ;;  %s3079_s0 = inlined_call_operand.vmem [shape: bf16[16,512], index: 0, kind: input, shape index: {}]   ;;  %s3080_s1 = inlined_call_operand.hbm [shape: bf16[2,512,1536], index: 1, kind: input, shape index: {}]   ;;  %s3081_s2 = inlined_call_operand.hbm [shape: bf16[1536,512], index: 2, kind: input, shape index: {}]   ;;  %s3082_s3 = inlined_call_operand.hbm [shape: f32[16,512], index: 3, kind: output, shape index: {}]  }
   0x1   :  { %10 = vsyncpa [#allocation3 + $0x1], 0 }
   0x2   :  { %11 = vsyncpa [#allocation6], 0 }
   0x3   :  { %13 = vsyncpa [#allocation6 + $0x1], 0 }
   0x4   :  { %14 = vsyncpa [#allocation4], 0  ;;  %s2722_s12 = smov 0   ;;  %s2724_s13 = smov 0  }
   0x5   :  { %s2726_s14 = smov 0   ;;  %s2728_s15 = smov 0  }
   0x6   :  { %s2730_s16 = smov 0   ;;  %s2732_s17 = smov 0  }
   0x7 LB: > { %s1880_s18 = sadd.s32 4294967295, %s2689_s17   ;;  %s29_s19 = sadd.s32 1, %s2685_s16  ;;  %s2689_s17 = sphi %s2732_s17, %s20_s17   ;;  %s2685_s16 = sphi %s2730_s16, %s3092_s16   ;;  %s2681_s15 = sphi %s2728_s15, %s3091_s15   ;;  %s2677_s14 = sphi %s2726_s14, %s3090_s14   ;;  %s2673_s13 = sphi %s2724_s13, %s3089_s13   ;;  %s2669_s12 = sphi %s2722_s12, %s3088_s12  }
   0x8   : > { %p30_p0 = scmp.ge.s32.totalorder %s29_s19, 6  ;;  %s65_s20 = sadd.s32 1, %s2677_s14 }
   0x9   : > { %p72_p1 = scmp.ne.s32.totalorder %s2677_s14, %s2673_s13  ;;  %p73_p2 = scmp.eq.s32.totalorder %s2689_s17, 0 }
   0xa   : > { %s3094_s19 = smov (%p30_p0, %s29_s19), 0  ;;  %p78_p4 = scmp.ne.s32.totalorder %s2673_s13, %s2669_s12 }
   0xb   : > { %p2758_p3 = por %p73_p2, %p72_p1  ;;  %s62_s22 = ssub.s32 %s2685_s16, %s3094_s19 }
   0xc   : > { %p79_p5 = scmp.eq.s32.totalorder %s1880_s18, 0  ;;  %p63_p6 = scmp.eq.s32.totalorder %s62_s22, 0 }
   0xd   : > { %p2181_p8 = scmp.lt.s32.totalorder %s2689_s17, 6  ;;  %s2776_s25 = sand.u32 1, %s2677_s14  }
   0xe   : > { %p2767_p7 = por %p79_p5, %p78_p4  ;;  %s2163_s26 = sshll.u32 %s2685_s16, 7 }
   0xf   : > { %s2773_s24 = scalar_select %p63_p6, %s2677_s14, %s65_s20  }
  0x10   : > { %s1884_s27 = sshll.u32 %s2776_s25, 10  ;;  %s174_s30 = scalar_lea.hbm %s3080_s1, %s2163_s26 }
  0x11   : > { %s168_s4 = scalar_lea.vmem [#allocation2], %s1884_s27  ;;  %p2785_p9 = pnand %p2181_p8, %p2758_p3 }
  0x12   : > { %s175_s5 = sshll.u32 %s168_s4, 4  ;;  %p1891_p10 = scmp.ge.s32.totalorder %s2689_s17, 1  ;;  %s176_s5 = int_to_ptr.vmem [resolvable:$true] %s175_s5 }
  0x13   : > { %s165_s7 = scalar_lea.sflag [#allocation3], %s2776_s25  ;;  %p2553_p11 = pneg %p2785_p9 }
  0x14   : > { %s2564_s8 = scalar_lea.vmem %s176_s5, 16384  ;;  %s2691_s9 = smov [#allocation2]  }
  0x15   : > { %p2565_p12 = scmp.ne.s32.totalorder %s176_s5, %s2564_s8  ;;  %s2569_s10 = sshll.u32 %s2691_s9, 4  ;;  %s2570_s10 = int_to_ptr.vmem [resolvable:$false] %s2569_s10 }
  0x16   : > { %s2571_s11 = scalar_lea.vmem %s2570_s10, 32768  ;;  %p2572_p1 = scmp.lt.s32.totalorder %s176_s5, %s2570_s10 }
  0x17   : > { %p2567_p13 = pnand %p2565_p12, %p2553_p11  ;;  %p2573_p2 = scmp.lt.s32.totalorder %s2571_s11, %s2564_s8 }
  0x19   : > { %p2568_p0 = pneg %p2567_p13  ;;  %p2574_p3 = por %p2573_p2, %p2572_p1 }
  0x1b   : > { %p2575_p4 = pnand %p2574_p3, %p2568_p0 }
  0x1d   : > { %2578 = shalt.err (!%p2575_p4)
}
  0x1e   : > { %s2692_s12 = smov 768   ;;  %s2693_s20 = smov 128  }
  0x1f   : > { %s2694_s21 = smov 8   ;;  %p205_p5 = scmp.lt.s32.totalorder %s2689_s17, 7 }
  0x20   : > { %2177 = dma.hbm_to_vmem [thread:$0]  (!%p2785_p9), %s174_s30, 16384, %s176_s5, %s165_s7, %s2692_s12, %s2693_s20, %s2694_s21  }
  0x21   : > { %s1887_s22 = sshll.u32 %s2776_s25, 9  ;;  %s2165_s26 = sshll.u32 %s2685_s16, 13 }
  0x22   : > { %p2803_p6 = pnand %p1891_p10, %p205_p5  ;;  %s196_s4 = scalar_lea.hbm %s3081_s2, %s2165_s26 }
  0x23   : > { %s189_s8 = scalar_lea.vmem [#allocation5], %s1887_s22  ;;  %s186_s10 = scalar_lea.sflag [#allocation6], %s2776_s25 }
  0x24   : > { %s197_s9 = sshll.u32 %s189_s8, 4  ;;  %s2695_s30 = smov [#allocation5]   ;;  %s198_s9 = int_to_ptr.vmem [resolvable:$true] %s197_s9 }
  0x25   : > { %s2592_s11 = scalar_lea.vmem %s198_s9, 8192  ;;  %s2597_s5 = sshll.u32 %s2695_s30, 4  ;;  %s2598_s5 = int_to_ptr.vmem [resolvable:$false] %s2597_s5 }
  0x26   : > { %p2593_p8 = scmp.ne.s32.totalorder %s198_s9, %s2592_s11  ;;  %s2599_s7 = scalar_lea.vmem %s2598_s5, 16384 }
  0x27   : > { %p2600_p10 = scmp.lt.s32.totalorder %s198_s9, %s2598_s5  ;;  %p2601_p0 = scmp.lt.s32.totalorder %s2599_s7, %s2592_s11 }
  0x28   : > { %p2595_p12 = pnand %p2593_p8, %p2553_p11 }
  0x29   : > { %p2602_p1 = por %p2601_p0, %p2600_p10 }
  0x2a   : > { %p2596_p13 = pneg %p2595_p12 }
  0x2c   : > { %p2603_p2 = pnand %p2602_p1, %p2596_p13 }
  0x2e   : > { %2606 = shalt.err (!%p2603_p2)
}
  0x2f   : > { %s2696_s12 = smov 256   ;;  %s2697_s20 = smov 16  }
  0x30   : > { %2180 = dma.hbm_to_vmem [thread:$0]  (!%p2785_p9), %s196_s4, 8192, %s198_s9, %s186_s10, %s2696_s12, %s2696_s12, %s2697_s20  }
  0x31   : > { %209 = sbr.rel (%p2803_p6) target bundleno = 613 (0x265), region = 32  ;;  %s211_s25 = sand.u32 (!%p2803_p6), 1, %s2673_s13  }
  0x32   : > { %s1892_s21 = sshll.u32 (!%p2803_p6), %s211_s25, 10  ;;  %s212_s22 = scalar_lea.sflag (!%p2803_p6), [#allocation3], %s211_s25 }
  0x33   : > { %s2819_s26 = scalar_lea.vmem (!%p2803_p6), [#allocation2], %s1892_s21 }
  0x36   : > { %2656 = dma.done.wait (%p2767_p7), %s212_s22, 16384  }
  0x37   : > { %2658 = vsyncadd (%p2767_p7), %s212_s22, 4294950912  ;;  %s1893_s28 = sshll.u32 %s211_s25, 9  ;;  %s221_s29 = scalar_lea.sflag [#allocation6], %s211_s25 }
  0x38   : > { %s2825_s6 = scalar_lea.vmem [#allocation5], %s1893_s28 }
  0x39   : > { %2660 = dma.done.wait (%p2767_p7), %s221_s29, 8192  }
  0x3a   : > { %2662 = vsyncadd (%p2767_p7), %s221_s29, 4294959104  ;;  %p1894_p9 = scmp.ne.s32.totalorder %s2681_s15, 0 }
  0x3c   : > { %266 = sbr.rel (%p1894_p9) target bundleno = 70 (0x46), region = 44 }
  0x41   : > { %v2698_v0 = vmov 0.0  }
  0x42   : > { %267 = vst [vmem:[#allocation7] sm:$0xff] %v2698_v0  ;;  %268 = vst [vmem:[#allocation7 + $0x8] sm:$0xff] %v2698_v0 }
  0x43   : > { %269 = vst [vmem:[#allocation7 + $0x10] sm:$0xff] %v2698_v0  ;;  %270 = vst [vmem:[#allocation7 + $0x18] sm:$0xff] %v2698_v0 }
  0x44   : > { %271 = vst [vmem:[#allocation7 + $0x20] sm:$0xff] %v2698_v0  ;;  %272 = vst [vmem:[#allocation7 + $0x28] sm:$0xff] %v2698_v0 }
  0x45   : > { %273 = vst [vmem:[#allocation7 + $0x30] sm:$0xff] %v2698_v0  ;;  %274 = vst [vmem:[#allocation7 + $0x38] sm:$0xff] %v2698_v0 }
  0x46 PF: > { %v2241_v1 = vld [vmem:[%s2819_s26 + $0x74] ss:$8 sps:$4 sm:$0xff]   ;;  %v2245_v3 = vld [vmem:[%s2819_s26 + $0x70] ss:$8 sps:$4 sm:$0xff]   ;;  %v2247_v5 = vld [vmem:[%s2819_s26 + $0x64] ss:$8 sps:$4 sm:$0xff]  }
  0x47   : > { %v2243_v2 = vld [vmem:[%s2819_s26 + $0x174] ss:$8 sps:$4 sm:$0xff]   ;;  %691 = vmatprep.subr.bf16.mxu0 %v2241_v1  ;;  %v2246_v4 = vld [vmem:[%s2819_s26 + $0x170] ss:$8 sps:$4 sm:$0xff]   ;;  %v2249_v6 = vld [vmem:[%s2819_s26 + $0x164] ss:$8 sps:$4 sm:$0xff]  }
  0x48   : > { %734 = vmatprep.subr.bf16.mxu1 %v2243_v2  ;;  %692 = vmatpush1.bf16.msra.mxu0 %v2245_v3  ;;  %v2251_v7 = vld [vmem:[%s2819_s26 + $0x60] ss:$8 sps:$4 sm:$0xff]   ;;  %v2253_v9 = vld [vmem:[%s2819_s26 + $0x54] ss:$8 sps:$4 sm:$0xff]   ;;  %v2257_v11 = vld [vmem:[%s2819_s26 + $0x50] ss:$8 sps:$4 sm:$0xff]  }
  0x49   : > { %735 = vmatpush1.bf16.msra.mxu1 %v2246_v4  ;;  %693 = vmatprep.subr.bf16.mxu0 %v2247_v5  ;;  %v2252_v8 = vld [vmem:[%s2819_s26 + $0x160] ss:$8 sps:$4 sm:$0xff]   ;;  %v2255_v10 = vld [vmem:[%s2819_s26 + $0x154] ss:$8 sps:$4 sm:$0xff]   ;;  %v2258_v12 = vld [vmem:[%s2819_s26 + $0x150] ss:$8 sps:$4 sm:$0xff]  }
  0x4a   : > { %736 = vmatprep.subr.bf16.mxu1 %v2249_v6  ;;  %v2259_v13 = vld [vmem:[%s2819_s26 + $0x44] ss:$8 sps:$4 sm:$0xff]   ;;  %v2263_v15 = vld [vmem:[%s2819_s26 + $0x40] ss:$8 sps:$4 sm:$0xff]   ;;  %v2265_v17 = vld [vmem:[%s2819_s26 + $0x34] ss:$8 sps:$4 sm:$0xff]  }
  0x4b   : > { %v2261_v14 = vld [vmem:[%s2819_s26 + $0x144] ss:$8 sps:$4 sm:$0xff]   ;;  %v2264_v16 = vld [vmem:[%s2819_s26 + $0x140] ss:$8 sps:$4 sm:$0xff]   ;;  %v2267_v18 = vld [vmem:[%s2819_s26 + $0x134] ss:$8 sps:$4 sm:$0xff]  }
  0x4c   : > { %694 = vmatpush1.bf16.msra.mxu0 %v2251_v7  ;;  %v2269_v19 = vld [vmem:[%s2819_s26 + $0x30] ss:$8 sps:$4 sm:$0xff]   ;;  %v2271_v21 = vld [vmem:[%s2819_s26 + $0x24] ss:$8 sps:$4 sm:$0xff]   ;;  %v2275_v23 = vld [vmem:[%s2819_s26 + $0x20] ss:$8 sps:$4 sm:$0xff]  }
  0x4d   : > { %737 = vmatpush1.bf16.msra.mxu1 %v2252_v8  ;;  %695 = vmatprep.subr.bf16.mxu0 %v2253_v9  ;;  %v2270_v20 = vld [vmem:[%s2819_s26 + $0x130] ss:$8 sps:$4 sm:$0xff]   ;;  %v2273_v22 = vld [vmem:[%s2819_s26 + $0x124] ss:$8 sps:$4 sm:$0xff]   ;;  %v2276_v24 = vld [vmem:[%s2819_s26 + $0x120] ss:$8 sps:$4 sm:$0xff]  }
  0x4e   : > { %738 = vmatprep.subr.bf16.mxu1 %v2255_v10  ;;  %v2277_v25 = vld [vmem:[%s2819_s26 + $0x14] ss:$8 sps:$4 sm:$0xff]   ;;  %v2281_v27 = vld [vmem:[%s2819_s26 + $0x10] ss:$8 sps:$4 sm:$0xff]   ;;  %v2283_v29 = vld [vmem:[%s2819_s26 + $0x4] ss:$8 sps:$4 sm:$0xff]  }
  0x4f   : > { %v2279_v26 = vld [vmem:[%s2819_s26 + $0x114] ss:$8 sps:$4 sm:$0xff]   ;;  %v2282_v28 = vld [vmem:[%s2819_s26 + $0x110] ss:$8 sps:$4 sm:$0xff]   ;;  %v2285_v30 = vld [vmem:[%s2819_s26 + $0x104] ss:$8 sps:$4 sm:$0xff]  }
  0x50   : > { %696 = vmatpush1.bf16.msra.mxu0 %v2257_v11  ;;  %v2287_v31 = vld [vmem:[%s2819_s26] ss:$8 sps:$4 sm:$0xff]   ;;  %v2289_v33 = vld [vmem:[%s2819_s26 + $0xf4] ss:$8 sps:$4 sm:$0xff]   ;;  %v2293_v35 = vld [vmem:[%s2819_s26 + $0xf0] ss:$8 sps:$4 sm:$0xff]  }
  0x51   : > { %739 = vmatpush1.bf16.msra.mxu1 %v2258_v12  ;;  %697 = vmatprep.subr.bf16.mxu0 %v2259_v13  ;;  %v2288_v32 = vld [vmem:[%s2819_s26 + $0x100] ss:$8 sps:$4 sm:$0xff]   ;;  %v2291_v34 = vld [vmem:[%s2819_s26 + $0x1f4] ss:$8 sps:$4 sm:$0xff]   ;;  %v2294_v36 = vld [vmem:[%s2819_s26 + $0x1f0] ss:$8 sps:$4 sm:$0xff]  }
  0x52   : > { %740 = vmatprep.subr.bf16.mxu1 %v2261_v14  ;;  %v2295_v37 = vld [vmem:[%s2819_s26 + $0xe4] ss:$8 sps:$4 sm:$0xff]   ;;  %v2299_v39 = vld [vmem:[%s2819_s26 + $0xe0] ss:$8 sps:$4 sm:$0xff]   ;;  %v2301_v41 = vld [vmem:[%s2819_s26 + $0xd4] ss:$8 sps:$4 sm:$0xff]  }
  0x53   : > { %v2297_v38 = vld [vmem:[%s2819_s26 + $0x1e4] ss:$8 sps:$4 sm:$0xff]   ;;  %v2300_v40 = vld [vmem:[%s2819_s26 + $0x1e0] ss:$8 sps:$4 sm:$0xff]   ;;  %v2303_v42 = vld [vmem:[%s2819_s26 + $0x1d4] ss:$8 sps:$4 sm:$0xff]  }
  0x54   : > { %698 = vmatpush1.bf16.msra.mxu0 %v2263_v15  ;;  %v2305_v43 = vld [vmem:[%s2819_s26 + $0xd0] ss:$8 sps:$4 sm:$0xff]   ;;  %v2307_v45 = vld [vmem:[%s2819_s26 + $0xc4] ss:$8 sps:$4 sm:$0xff]   ;;  %v2311_v47 = vld [vmem:[%s2819_s26 + $0xc0] ss:$8 sps:$4 sm:$0xff]  }
  0x55   : > { %741 = vmatpush1.bf16.msra.mxu1 %v2264_v16  ;;  %699 = vmatprep.subr.bf16.mxu0 %v2265_v17  ;;  %v2306_v44 = vld [vmem:[%s2819_s26 + $0x1d0] ss:$8 sps:$4 sm:$0xff]   ;;  %v2309_v46 = vld [vmem:[%s2819_s26 + $0x1c4] ss:$8 sps:$4 sm:$0xff]   ;;  %v2312_v48 = vld [vmem:[%s2819_s26 + $0x1c0] ss:$8 sps:$4 sm:$0xff]  }
  0x56   : > { %742 = vmatprep.subr.bf16.mxu1 %v2267_v18  ;;  %v2313_v49 = vld [vmem:[%s2819_s26 + $0xb4] ss:$8 sps:$4 sm:$0xff]   ;;  %v2317_v53 = vld [vmem:[%s2819_s26 + $0xb0] ss:$8 sps:$4 sm:$0xff]   ;;  %v2319_v55 = vld [vmem:[%s2819_s26 + $0xa4] ss:$8 sps:$4 sm:$0xff]  }
  0x57   : > { %v2339_v50 = vld [vmem:[%s3079_s0 + $0x4] ss:$16 sps:$4 sm:$0xff]   ;;  %v2342_v52 = vld [vmem:[%s3079_s0 + $0xc] ss:$16 sps:$4 sm:$0xff]   ;;  %v2318_v54 = vld [vmem:[%s2819_s26 + $0x1b0] ss:$8 sps:$4 sm:$0xff]  }
  0x58   : > { %700 = vmatpush1.bf16.msra.mxu0 %v2269_v19  ;;  %v2315_v51 = vld [vmem:[%s2819_s26 + $0x1b4] ss:$8 sps:$4 sm:$0xff]   ;;  %723 = vmatprep.mubr.bf16.mxu0 %v2339_v50  ;;  %v2321_v56 = vld [vmem:[%s2819_s26 + $0x1a4] ss:$8 sps:$4 sm:$0xff]   ;;  %v2323_v57 = vld [vmem:[%s2819_s26 + $0xa0] ss:$8 sps:$4 sm:$0xff]  }
  0x59   : > { %743 = vmatpush1.bf16.msra.mxu1 %v2270_v20  ;;  %701 = vmatprep.subr.bf16.mxu0 %v2271_v21  ;;  %v2324_v58 = vld [vmem:[%s2819_s26 + $0x1a0] ss:$8 sps:$4 sm:$0xff]   ;;  %v2325_v59 = vld [vmem:[%s2819_s26 + $0x94] ss:$8 sps:$4 sm:$0xff]   ;;  %v2329_v61 = vld [vmem:[%s2819_s26 + $0x90] ss:$8 sps:$4 sm:$0xff]  }
  0x5a   : > { %744 = vmatprep.subr.bf16.mxu1 %v2273_v22  ;;  %766 = vmatprep.mubr.bf16.mxu1 %v2342_v52  ;;  %v2327_v60 = vld [vmem:[%s2819_s26 + $0x194] ss:$8 sps:$4 sm:$0xff]   ;;  %v2330_v62 = vld [vmem:[%s2819_s26 + $0x190] ss:$8 sps:$4 sm:$0xff]   ;;  %v2331_v63 = vld [vmem:[%s2819_s26 + $0x84] ss:$8 sps:$4 sm:$0xff]  }
  0x5b   : > { %v2333_v0 = vld [vmem:[%s2819_s26 + $0x184] ss:$8 sps:$4 sm:$0xff]   ;;  %v2335_v1 = vld [vmem:[%s2819_s26 + $0x80] ss:$8 sps:$4 sm:$0xff]   ;;  %v2345_v3 = vld [vmem:[%s2819_s26 + $0x274] ss:$8 sps:$4 sm:$0xff]  }
  0x5c   : > { %702 = vmatpush1.bf16.msra.mxu0 %v2275_v23  ;;  %v2336_v2 = vld [vmem:[%s2819_s26 + $0x180] ss:$8 sps:$4 sm:$0xff]   ;;  %v2348_v4 = vld [vmem:[%s2819_s26 + $0x374] ss:$8 sps:$4 sm:$0xff]   ;;  %v2343_v7 = vld [vmem:[%s2819_s26 + $0x270] ss:$8 sps:$4 sm:$0xff]  }
  0x5d   : > { %745 = vmatpush1.bf16.msra.mxu1 %v2276_v24  ;;  %703 = vmatprep.subr.bf16.mxu0 %v2277_v25  ;;  %v2907_v5 = vld [vmem:[%s3079_s0] ss:$16 sps:$4 sm:$0xff]   ;;  %v2912_v6 = vld [vmem:[%s3079_s0 + $0x8] ss:$16 sps:$4 sm:$0xff]   ;;  %v2351_v9 = vld [vmem:[%s2819_s26 + $0x264] ss:$8 sps:$4 sm:$0xff]  }
  0x5e   : > { %746 = vmatprep.subr.bf16.mxu1 %v2279_v26  ;;  %v2346_v8 = vld [vmem:[%s2819_s26 + $0x370] ss:$8 sps:$4 sm:$0xff]   ;;  %v2354_v10 = vld [vmem:[%s2819_s26 + $0x364] ss:$8 sps:$4 sm:$0xff]   ;;  %v2349_v11 = vld [vmem:[%s2819_s26 + $0x260] ss:$8 sps:$4 sm:$0xff]  }
  0x5f   : > { %v2352_v12 = vld [vmem:[%s2819_s26 + $0x360] ss:$8 sps:$4 sm:$0xff]   ;;  %v2357_v13 = vld [vmem:[%s2819_s26 + $0x254] ss:$8 sps:$4 sm:$0xff]   ;;  %v2355_v15 = vld [vmem:[%s2819_s26 + $0x250] ss:$8 sps:$4 sm:$0xff]  }
  0x60   : > { %704 = vmatpush1.bf16.msra.mxu0 %v2281_v27  ;;  %v2360_v14 = vld [vmem:[%s2819_s26 + $0x354] ss:$8 sps:$4 sm:$0xff]   ;;  %v2358_v16 = vld [vmem:[%s2819_s26 + $0x350] ss:$8 sps:$4 sm:$0xff]   ;;  %v2363_v17 = vld [vmem:[%s2819_s26 + $0x244] ss:$8 sps:$4 sm:$0xff]  }
  0x61   : > { %747 = vmatpush1.bf16.msra.mxu1 %v2282_v28  ;;  %705 = vmatprep.subr.bf16.mxu0 %v2283_v29  ;;  %v2366_v18 = vld [vmem:[%s2819_s26 + $0x344] ss:$8 sps:$4 sm:$0xff]   ;;  %v2361_v19 = vld [vmem:[%s2819_s26 + $0x240] ss:$8 sps:$4 sm:$0xff]   ;;  %v2369_v21 = vld [vmem:[%s2819_s26 + $0x234] ss:$8 sps:$4 sm:$0xff]  }
  0x62   : > { %748 = vmatprep.subr.bf16.mxu1 %v2285_v30  ;;  %v2364_v20 = vld [vmem:[%s2819_s26 + $0x340] ss:$8 sps:$4 sm:$0xff]   ;;  %v2372_v22 = vld [vmem:[%s2819_s26 + $0x334] ss:$8 sps:$4 sm:$0xff]   ;;  %v2367_v23 = vld [vmem:[%s2819_s26 + $0x230] ss:$8 sps:$4 sm:$0xff]  }
  0x63   : > { %v2370_v24 = vld [vmem:[%s2819_s26 + $0x330] ss:$8 sps:$4 sm:$0xff]   ;;  %v2375_v25 = vld [vmem:[%s2819_s26 + $0x224] ss:$8 sps:$4 sm:$0xff]   ;;  %v2373_v27 = vld [vmem:[%s2819_s26 + $0x220] ss:$8 sps:$4 sm:$0xff]  }
  0x64   : > { %706 = vmatpush1.bf16.msra.mxu0 %v2287_v31  ;;  %v2378_v26 = vld [vmem:[%s2819_s26 + $0x324] ss:$8 sps:$4 sm:$0xff]   ;;  %v2376_v28 = vld [vmem:[%s2819_s26 + $0x320] ss:$8 sps:$4 sm:$0xff]   ;;  %v2381_v29 = vld [vmem:[%s2819_s26 + $0x214] ss:$8 sps:$4 sm:$0xff]  }
  0x65   : > { %749 = vmatpush1.bf16.msra.mxu1 %v2288_v32  ;;  %707 = vmatprep.subr.bf16.mxu0 %v2289_v33  ;;  %v2384_v30 = vld [vmem:[%s2819_s26 + $0x314] ss:$8 sps:$4 sm:$0xff]   ;;  %v2379_v31 = vld [vmem:[%s2819_s26 + $0x210] ss:$8 sps:$4 sm:$0xff]   ;;  %v2387_v33 = vld [vmem:[%s2819_s26 + $0x204] ss:$8 sps:$4 sm:$0xff]  }
  0x66   : > { %750 = vmatprep.subr.bf16.mxu1 %v2291_v34  ;;  %v2382_v32 = vld [vmem:[%s2819_s26 + $0x310] ss:$8 sps:$4 sm:$0xff]   ;;  %v2390_v34 = vld [vmem:[%s2819_s26 + $0x304] ss:$8 sps:$4 sm:$0xff]   ;;  %s2699_s30 = smov [#allocation7]   ;;  %p3046_p7 = scmp.eq.s32.totalorder %s1880_s18, 5 }
  0x67   : > { %s1778_s5 = sshll.u32 %s2699_s30, 4  ;;  %s1779_s5 = int_to_ptr.vmem [resolvable:$true] %s1778_s5 }
  0x68   : > { %708 = vmatpush2.bf16.msra.mxu0 %v2293_v35  ;;  %v2385_v35 = vld [vmem:[%s2819_s26 + $0x200] ss:$8 sps:$4 sm:$0xff]   ;;  %s2607_s12 = scalar_lea.vmem %s1779_s5, 1024  ;;  %p2614_p5 = scmp.lt.s32.totalorder %s1779_s5, %s1779_s5 }
  0x69   : > { %751 = vmatpush2.bf16.msra.mxu1 %v2294_v36  ;;  %709 = vmatprep.subr.bf16.mxu0 %v2295_v37  ;;  %v2388_v36 = vld [vmem:[%s2819_s26 + $0x300] ss:$8 sps:$4 sm:$0xff]   ;;  %v2393_v37 = vld [vmem:[%s2819_s26 + $0x2f4] ss:$8 sps:$4 sm:$0xff]   ;;  %p2608_p11 = scmp.ne.s32.totalorder %s1779_s5, %s2607_s12  ;;  %p2615_p6 = scmp.lt.s32.totalorder %s2607_s12, %s2607_s12 }
  0x6a   : > { %752 = vmatprep.subr.bf16.mxu1 %v2297_v38  ;;  %v2396_v38 = vld [vmem:[%s2819_s26 + $0x3f4] ss:$8 sps:$4 sm:$0xff]  }
  0x6b   : > { %p2609_p3 = pnand %p2608_p11, %p3046_p7  ;;  %p2616_p8 = por %p2615_p6, %p2614_p5 }
  0x6c   : > { %710 = vmatpush2.bf16.msra.mxu0 %v2299_v39  ;;  %v2391_v39 = vld [vmem:[%s2819_s26 + $0x2f0] ss:$8 sps:$4 sm:$0xff]  }
  0x6d   : > { %753 = vmatpush2.bf16.msra.mxu1 %v2300_v40  ;;  %711 = vmatprep.subr.bf16.mxu0 %v2301_v41  ;;  %v2394_v40 = vld [vmem:[%s2819_s26 + $0x3f0] ss:$8 sps:$4 sm:$0xff]   ;;  %v2399_v41 = vld [vmem:[%s2819_s26 + $0x2e4] ss:$8 sps:$4 sm:$0xff]   ;;  %p2610_p4 = pneg %p2609_p3 }
  0x6e   : > { %754 = vmatprep.subr.bf16.mxu1 %v2303_v42  ;;  %v2402_v42 = vld [vmem:[%s2819_s26 + $0x3e4] ss:$8 sps:$4 sm:$0xff]  }
  0x6f   : > { %p2617_p12 = pnand %p2616_p8, %p2610_p4 }
  0x70   : > { %712 = vmatpush2.bf16.msra.mxu0 %v2305_v43  ;;  %v2397_v43 = vld [vmem:[%s2819_s26 + $0x2e0] ss:$8 sps:$4 sm:$0xff]  }
  0x71   : > { %755 = vmatpush2.bf16.msra.mxu1 %v2306_v44  ;;  %713 = vmatprep.subr.bf16.mxu0 %v2307_v45  ;;  %v2400_v44 = vld [vmem:[%s2819_s26 + $0x3e0] ss:$8 sps:$4 sm:$0xff]   ;;  %v2405_v45 = vld [vmem:[%s2819_s26 + $0x2d4] ss:$8 sps:$4 sm:$0xff]  }
  0x72   : > { %756 = vmatprep.subr.bf16.mxu1 %v2309_v46  ;;  %v2408_v46 = vld [vmem:[%s2819_s26 + $0x3d4] ss:$8 sps:$4 sm:$0xff]  }
  0x74   : > { %714 = vmatpush2.bf16.msra.mxu0 %v2311_v47  ;;  %v2403_v47 = vld [vmem:[%s2819_s26 + $0x2d0] ss:$8 sps:$4 sm:$0xff]  }
  0x75   : > { %757 = vmatpush2.bf16.msra.mxu1 %v2312_v48  ;;  %715 = vmatprep.subr.bf16.mxu0 %v2313_v49  ;;  %v2406_v48 = vld [vmem:[%s2819_s26 + $0x3d0] ss:$8 sps:$4 sm:$0xff]   ;;  %v2411_v49 = vld [vmem:[%s2819_s26 + $0x2c4] ss:$8 sps:$4 sm:$0xff]  }
  0x76   : > { %758 = vmatprep.subr.bf16.mxu1 %v2315_v51  ;;  %v2409_v51 = vld [vmem:[%s2819_s26 + $0x2c0] ss:$8 sps:$4 sm:$0xff]  }
  0x78   : > { %716 = vmatpush2.bf16.msra.mxu0 %v2317_v53  ;;  %v2417_v53 = vld [vmem:[%s2819_s26 + $0x2b4] ss:$8 sps:$4 sm:$0xff]  }
  0x79   : > { %759 = vmatpush2.bf16.msra.mxu1 %v2318_v54  ;;  %717 = vmatprep.subr.bf16.mxu0 %v2319_v55  ;;  %v2420_v54 = vld [vmem:[%s2819_s26 + $0x3b4] ss:$8 sps:$4 sm:$0xff]   ;;  %v2415_v55 = vld [vmem:[%s2819_s26 + $0x2b0] ss:$8 sps:$4 sm:$0xff]  }
  0x7a   : > { %760 = vmatprep.subr.bf16.mxu1 %v2321_v56  ;;  %v2418_v56 = vld [vmem:[%s2819_s26 + $0x3b0] ss:$8 sps:$4 sm:$0xff]  }
  0x7c   : > { %718 = vmatpush2.bf16.msra.mxu0 %v2323_v57  ;;  %v2423_v57 = vld [vmem:[%s2819_s26 + $0x2a4] ss:$8 sps:$4 sm:$0xff]  }
  0x7d   : > { %761 = vmatpush2.bf16.msra.mxu1 %v2324_v58  ;;  %719 = vmatprep.subr.bf16.mxu0 %v2325_v59  ;;  %v2426_v58 = vld [vmem:[%s2819_s26 + $0x3a4] ss:$8 sps:$4 sm:$0xff]   ;;  %v2421_v59 = vld [vmem:[%s2819_s26 + $0x2a0] ss:$8 sps:$4 sm:$0xff]  }
  0x7e   : > { %762 = vmatprep.subr.bf16.mxu1 %v2327_v60  ;;  %v2424_v60 = vld [vmem:[%s2819_s26 + $0x3a0] ss:$8 sps:$4 sm:$0xff]  }
  0x80   : > { %720 = vmatpush2.bf16.msra.mxu0 %v2329_v61  ;;  %v2429_v61 = vld [vmem:[%s2819_s26 + $0x294] ss:$8 sps:$4 sm:$0xff]  }
  0x81   : > { %763 = vmatpush2.bf16.msra.mxu1 %v2330_v62  ;;  %721 = vmatprep.subr.bf16.mxu0 %v2331_v63  ;;  %v2432_v62 = vld [vmem:[%s2819_s26 + $0x394] ss:$8 sps:$4 sm:$0xff]   ;;  %v2427_v63 = vld [vmem:[%s2819_s26 + $0x290] ss:$8 sps:$4 sm:$0xff]  }
  0x82   : > { %764 = vmatprep.subr.bf16.mxu1 %v2333_v0  ;;  %v2430_v0 = vld [vmem:[%s2819_s26 + $0x390] ss:$8 sps:$4 sm:$0xff]  }
  0x84   : > { %722 = vmatpush2.bf16.msra.mxu0 %v2335_v1  ;;  %v2435_v1 = vld [vmem:[%s2819_s26 + $0x284] ss:$8 sps:$4 sm:$0xff]  }
  0x85   : > { %765 = vmatpush2.bf16.msra.mxu1 %v2336_v2  ;;  %1162 = vmatprep.subr.bf16.mxu0 %v2345_v3  ;;  %v2438_v2 = vld [vmem:[%s2819_s26 + $0x384] ss:$8 sps:$4 sm:$0xff]   ;;  %v2433_v3 = vld [vmem:[%s2819_s26 + $0x280] ss:$8 sps:$4 sm:$0xff]  }
  0x86   : > { %1205 = vmatprep.subr.bf16.mxu1 %v2348_v4  ;;  %v2436_v4 = vld [vmem:[%s2819_s26 + $0x380] ss:$8 sps:$4 sm:$0xff]  }
  0x87   : > { %724 = vmatmul.mubr.bf16.vlgmr.msra.gmra.mxu0 %v2907_v5 }
  0x88   : > { %767 = vmatmul.mubr.bf16.vlgmr.msra.gmra.mxu1 %v2912_v6  ;;  %1163 = vmatpush1.bf16.msra.mxu0 %v2343_v7  ;;  %v2441_v7 = vld [vmem:[%s2825_s6 + $0xe4] ss:$16 sps:$4 sm:$0xff]  }
  0x89   : > { %1206 = vmatpush1.bf16.msra.mxu1 %v2346_v8  ;;  %1164 = vmatprep.subr.bf16.mxu0 %v2351_v9  ;;  %v2444_v8 = vld [vmem:[%s2825_s6 + $0xec] ss:$16 sps:$4 sm:$0xff]   ;;  %v2439_v9 = vld [vmem:[%s2825_s6 + $0xe0] ss:$16 sps:$4 sm:$0xff]  }
  0x8a   : > { %1207 = vmatprep.subr.bf16.mxu1 %v2354_v10  ;;  %1194 = vmatprep.mubr.bf16.mxu0 %v2339_v50  ;;  %v2414_v50 = vld [vmem:[%s2819_s26 + $0x3c4] ss:$8 sps:$4 sm:$0xff]   ;;  %v2442_v10 = vld [vmem:[%s2825_s6 + $0xe8] ss:$16 sps:$4 sm:$0xff]  }
  0x8b   : > { %1237 = vmatprep.mubr.bf16.mxu1 %v2342_v52  ;;  %v2412_v52 = vld [vmem:[%s2819_s26 + $0x3c0] ss:$8 sps:$4 sm:$0xff]  }
  0x8c   : > { %1165 = vmatpush1.bf16.msra.mxu0 %v2349_v11  ;;  %v2447_v11 = vld [vmem:[%s2825_s6 + $0xc4] ss:$16 sps:$4 sm:$0xff]  }
  0x8d   : > { %1208 = vmatpush1.bf16.msra.mxu1 %v2352_v12  ;;  %1166 = vmatprep.subr.bf16.mxu0 %v2357_v13  ;;  %v2450_v12 = vld [vmem:[%s2825_s6 + $0xcc] ss:$16 sps:$4 sm:$0xff]   ;;  %v2445_v13 = vld [vmem:[%s2825_s6 + $0xc0] ss:$16 sps:$4 sm:$0xff]  }
  0x8e   : > { %1209 = vmatprep.subr.bf16.mxu1 %v2360_v14  ;;  %v2456_v14 = vld [vmem:[%s2825_s6 + $0xac] ss:$16 sps:$4 sm:$0xff]  }
  0x90   : > { %1167 = vmatpush1.bf16.msra.mxu0 %v2355_v15  ;;  %v2451_v15 = vld [vmem:[%s2825_s6 + $0xa0] ss:$16 sps:$4 sm:$0xff]  }
  0x91   : > { %1210 = vmatpush1.bf16.msra.mxu1 %v2358_v16  ;;  %1168 = vmatprep.subr.bf16.mxu0 %v2363_v17  ;;  %v2454_v16 = vld [vmem:[%s2825_s6 + $0xa8] ss:$16 sps:$4 sm:$0xff]   ;;  %v2459_v17 = vld [vmem:[%s2825_s6 + $0x84] ss:$16 sps:$4 sm:$0xff]  }
  0x92   : > { %1211 = vmatprep.subr.bf16.mxu1 %v2366_v18  ;;  %v2462_v18 = vld [vmem:[%s2825_s6 + $0x8c] ss:$16 sps:$4 sm:$0xff]  }
  0x94   : > { %1169 = vmatpush1.bf16.msra.mxu0 %v2361_v19  ;;  %v2457_v19 = vld [vmem:[%s2825_s6 + $0x80] ss:$16 sps:$4 sm:$0xff]  }
  0x95   : > { %1212 = vmatpush1.bf16.msra.mxu1 %v2364_v20  ;;  %1170 = vmatprep.subr.bf16.mxu0 %v2369_v21  ;;  %v2460_v20 = vld [vmem:[%s2825_s6 + $0x88] ss:$16 sps:$4 sm:$0xff]   ;;  %v2465_v21 = vld [vmem:[%s2825_s6 + $0x64] ss:$16 sps:$4 sm:$0xff]  }
  0x96   : > { %1213 = vmatprep.subr.bf16.mxu1 %v2372_v22  ;;  %v2468_v22 = vld [vmem:[%s2825_s6 + $0x6c] ss:$16 sps:$4 sm:$0xff]  }
  0x98   : > { %1171 = vmatpush1.bf16.msra.mxu0 %v2367_v23  ;;  %v2463_v23 = vld [vmem:[%s2825_s6 + $0x60] ss:$16 sps:$4 sm:$0xff]  }
  0x99   : > { %1214 = vmatpush1.bf16.msra.mxu1 %v2370_v24  ;;  %1172 = vmatprep.subr.bf16.mxu0 %v2375_v25  ;;  %v2466_v24 = vld [vmem:[%s2825_s6 + $0x68] ss:$16 sps:$4 sm:$0xff]   ;;  %v2471_v25 = vld [vmem:[%s2825_s6 + $0x44] ss:$16 sps:$4 sm:$0xff]  }
  0x9a   : > { %1215 = vmatprep.subr.bf16.mxu1 %v2378_v26  ;;  %v2474_v26 = vld [vmem:[%s2825_s6 + $0x4c] ss:$16 sps:$4 sm:$0xff]  }
  0x9c   : > { %1173 = vmatpush1.bf16.msra.mxu0 %v2373_v27  ;;  %v2469_v27 = vld [vmem:[%s2825_s6 + $0x40] ss:$16 sps:$4 sm:$0xff]  }
  0x9d   : > { %1216 = vmatpush1.bf16.msra.mxu1 %v2376_v28  ;;  %1174 = vmatprep.subr.bf16.mxu0 %v2381_v29  ;;  %v2472_v28 = vld [vmem:[%s2825_s6 + $0x48] ss:$16 sps:$4 sm:$0xff]   ;;  %v2477_v29 = vld [vmem:[%s2825_s6 + $0x24] ss:$16 sps:$4 sm:$0xff]  }
  0x9e   : > { %1217 = vmatprep.subr.bf16.mxu1 %v2384_v30  ;;  %v2480_v30 = vld [vmem:[%s2825_s6 + $0x2c] ss:$16 sps:$4 sm:$0xff]  }
  0xa0   : > { %1175 = vmatpush1.bf16.msra.mxu0 %v2379_v31  ;;  %v2475_v31 = vld [vmem:[%s2825_s6 + $0x20] ss:$16 sps:$4 sm:$0xff]  }
  0xa1   : > { %1218 = vmatpush1.bf16.msra.mxu1 %v2382_v32  ;;  %1176 = vmatprep.subr.bf16.mxu0 %v2387_v33  ;;  %v2478_v32 = vld [vmem:[%s2825_s6 + $0x28] ss:$16 sps:$4 sm:$0xff]   ;;  %v2483_v33 = vld [vmem:[%s2825_s6 + $0x4] ss:$16 sps:$4 sm:$0xff]  }
  0xa2   : > { %1219 = vmatprep.subr.bf16.mxu1 %v2390_v34  ;;  %v2486_v34 = vld [vmem:[%s2825_s6 + $0xc] ss:$16 sps:$4 sm:$0xff]  }
  0xa4   : > { %1177 = vmatpush1.bf16.msra.mxu0 %v2385_v35  ;;  %v2481_v35 = vld [vmem:[%s2825_s6] ss:$16 sps:$4 sm:$0xff]  }
  0xa5   : > { %1220 = vmatpush1.bf16.msra.mxu1 %v2388_v36  ;;  %1178 = vmatprep.subr.bf16.mxu0 %v2393_v37  ;;  %v2484_v36 = vld [vmem:[%s2825_s6 + $0x8] ss:$16 sps:$4 sm:$0xff]   ;;  %v2489_v37 = vld [vmem:[%s2825_s6 + $0x1e4] ss:$16 sps:$4 sm:$0xff]  }
  0xa6   : > { %1221 = vmatprep.subr.bf16.mxu1 %v2396_v38  ;;  %v2492_v38 = vld [vmem:[%s2825_s6 + $0x1ec] ss:$16 sps:$4 sm:$0xff]  }
  0xa8   : > { %1179 = vmatpush2.bf16.msra.mxu0 %v2391_v39  ;;  %v2487_v39 = vld [vmem:[%s2825_s6 + $0x1e0] ss:$16 sps:$4 sm:$0xff]  }
  0xa9   : > { %1222 = vmatpush2.bf16.msra.mxu1 %v2394_v40  ;;  %1180 = vmatprep.subr.bf16.mxu0 %v2399_v41  ;;  %v2490_v40 = vld [vmem:[%s2825_s6 + $0x1e8] ss:$16 sps:$4 sm:$0xff]   ;;  %v2495_v41 = vld [vmem:[%s2825_s6 + $0x1c4] ss:$16 sps:$4 sm:$0xff]  }
  0xaa   : > { %1223 = vmatprep.subr.bf16.mxu1 %v2402_v42  ;;  %v2498_v42 = vld [vmem:[%s2825_s6 + $0x1cc] ss:$16 sps:$4 sm:$0xff]  }
  0xac   : > { %1181 = vmatpush2.bf16.msra.mxu0 %v2397_v43  ;;  %v2493_v43 = vld [vmem:[%s2825_s6 + $0x1c0] ss:$16 sps:$4 sm:$0xff]  }
  0xad   : > { %1224 = vmatpush2.bf16.msra.mxu1 %v2400_v44  ;;  %1182 = vmatprep.subr.bf16.mxu0 %v2405_v45  ;;  %v2496_v44 = vld [vmem:[%s2825_s6 + $0x1c8] ss:$16 sps:$4 sm:$0xff]   ;;  %v2501_v45 = vld [vmem:[%s2825_s6 + $0x1a4] ss:$16 sps:$4 sm:$0xff]  }
  0xae   : > { %1225 = vmatprep.subr.bf16.mxu1 %v2408_v46  ;;  %v2504_v46 = vld [vmem:[%s2825_s6 + $0x1ac] ss:$16 sps:$4 sm:$0xff]  }
  0xb0   : > { %1183 = vmatpush2.bf16.msra.mxu0 %v2403_v47  ;;  %v2499_v47 = vld [vmem:[%s2825_s6 + $0x1a0] ss:$16 sps:$4 sm:$0xff]  }
  0xb1   : > { %1226 = vmatpush2.bf16.msra.mxu1 %v2406_v48  ;;  %1184 = vmatprep.subr.bf16.mxu0 %v2411_v49  ;;  %v2502_v48 = vld [vmem:[%s2825_s6 + $0x1a8] ss:$16 sps:$4 sm:$0xff]   ;;  %v2507_v49 = vld [vmem:[%s2825_s6 + $0x184] ss:$16 sps:$4 sm:$0xff]  }
  0xb2   : > { %1227 = vmatprep.subr.bf16.mxu1 %v2414_v50  ;;  %v2510_v50 = vld [vmem:[%s2825_s6 + $0x18c] ss:$16 sps:$4 sm:$0xff]  }
  0xb4   : > { %1185 = vmatpush2.bf16.msra.mxu0 %v2409_v51  ;;  %v2505_v51 = vld [vmem:[%s2825_s6 + $0x180] ss:$16 sps:$4 sm:$0xff]  }
  0xb5   : > { %1228 = vmatpush2.bf16.msra.mxu1 %v2412_v52  ;;  %1186 = vmatprep.subr.bf16.mxu0 %v2417_v53  ;;  %v2508_v52 = vld [vmem:[%s2825_s6 + $0x188] ss:$16 sps:$4 sm:$0xff]   ;;  %v2513_v53 = vld [vmem:[%s2825_s6 + $0x164] ss:$16 sps:$4 sm:$0xff]  }
  0xb6   : > { %1229 = vmatprep.subr.bf16.mxu1 %v2420_v54  ;;  %v2516_v54 = vld [vmem:[%s2825_s6 + $0x16c] ss:$16 sps:$4 sm:$0xff]  }
  0xb8   : > { %1187 = vmatpush2.bf16.msra.mxu0 %v2415_v55  ;;  %v2511_v55 = vld [vmem:[%s2825_s6 + $0x160] ss:$16 sps:$4 sm:$0xff]  }
  0xb9   : > { %1230 = vmatpush2.bf16.msra.mxu1 %v2418_v56  ;;  %1188 = vmatprep.subr.bf16.mxu0 %v2423_v57  ;;  %v2514_v56 = vld [vmem:[%s2825_s6 + $0x168] ss:$16 sps:$4 sm:$0xff]   ;;  %v2519_v57 = vld [vmem:[%s2825_s6 + $0x144] ss:$16 sps:$4 sm:$0xff]  }
  0xba   : > { %1231 = vmatprep.subr.bf16.mxu1 %v2426_v58  ;;  %v2522_v58 = vld [vmem:[%s2825_s6 + $0x14c] ss:$16 sps:$4 sm:$0xff]  }
  0xbc   : > { %1189 = vmatpush2.bf16.msra.mxu0 %v2421_v59  ;;  %v2517_v59 = vld [vmem:[%s2825_s6 + $0x140] ss:$16 sps:$4 sm:$0xff]  }
  0xbd   : > { %1232 = vmatpush2.bf16.msra.mxu1 %v2424_v60  ;;  %1190 = vmatprep.subr.bf16.mxu0 %v2429_v61  ;;  %v2520_v60 = vld [vmem:[%s2825_s6 + $0x148] ss:$16 sps:$4 sm:$0xff]   ;;  %v2525_v61 = vld [vmem:[%s2825_s6 + $0x124] ss:$16 sps:$4 sm:$0xff]  }
  0xbe   : > { %1233 = vmatprep.subr.bf16.mxu1 %v2432_v62  ;;  %v2528_v62 = vld [vmem:[%s2825_s6 + $0x12c] ss:$16 sps:$4 sm:$0xff]  }
  0xc0   : > { %1191 = vmatpush2.bf16.msra.mxu0 %v2427_v63  ;;  %v2523_v63 = vld [vmem:[%s2825_s6 + $0x120] ss:$16 sps:$4 sm:$0xff]  }
  0xc1   : > { %1234 = vmatpush2.bf16.msra.mxu1 %v2430_v0  ;;  %1192 = vmatprep.subr.bf16.mxu0 %v2435_v1  ;;  %v2526_v0 = vld [vmem:[%s2825_s6 + $0x128] ss:$16 sps:$4 sm:$0xff]   ;;  %v2531_v1 = vld [vmem:[%s2825_s6 + $0x104] ss:$16 sps:$4 sm:$0xff]  }
  0xc2   : > { %1235 = vmatprep.subr.bf16.mxu1 %v2438_v2  ;;  %v2534_v2 = vld [vmem:[%s2825_s6 + $0x10c] ss:$16 sps:$4 sm:$0xff]  }
  0xc4   : > { %1193 = vmatpush2.bf16.msra.mxu0 %v2433_v3  ;;  %v2529_v3 = vld [vmem:[%s2825_s6 + $0x100] ss:$16 sps:$4 sm:$0xff]  }
  0xc5   : > { %1236 = vmatpush2.bf16.msra.mxu1 %v2436_v4  ;;  %1666 = vmatprep.subr.bf16.mxu0 %v2441_v7  ;;  %v2532_v4 = vld [vmem:[%s2825_s6 + $0x108] ss:$16 sps:$4 sm:$0xff]  }
  0xc6   : > { %1709 = vmatprep.subr.bf16.mxu1 %v2444_v8 }
  0xc7   : > { %1195 = vmatmul.mubr.bf16.vlgmr.msra.gmra.mxu0 %v2907_v5  ;;  %v2448_v5 = vld [vmem:[%s2825_s6 + $0xc8] ss:$16 sps:$4 sm:$0xff]  }
  0xc8   : > { %1238 = vmatmul.mubr.bf16.vlgmr.msra.gmra.mxu1 %v2912_v6  ;;  %1667 = vmatpush1.bf16.msra.mxu0 %v2439_v9  ;;  %v2453_v6 = vld [vmem:[%s2825_s6 + $0xa4] ss:$16 sps:$4 sm:$0xff]  }
  0xc9   : > { %1710 = vmatpush1.bf16.msra.mxu1 %v2442_v10  ;;  %1668 = vmatprep.subr.bf16.mxu0 %v2447_v11 }
  0xca   : > { %1711 = vmatprep.subr.bf16.mxu1 %v2450_v12 }
  0xcc   : > { %1669 = vmatpush1.bf16.msra.mxu0 %v2445_v13 }
  0xcd   : > { %1712 = vmatpush1.bf16.msra.mxu1 %v2448_v5  ;;  %1670 = vmatprep.subr.bf16.mxu0 %v2453_v6 }
  0xce   : > { %1713 = vmatprep.subr.bf16.mxu1 %v2456_v14 }
  0xd0   : > { %1671 = vmatpush1.bf16.msra.mxu0 %v2451_v15 }
  0xd1   : > { %1714 = vmatpush1.bf16.msra.mxu1 %v2454_v16  ;;  %1672 = vmatprep.subr.bf16.mxu0 %v2459_v17 }
  0xd2   : > { %1715 = vmatprep.subr.bf16.mxu1 %v2462_v18 }
  0xd4   : > { %1673 = vmatpush1.bf16.msra.mxu0 %v2457_v19 }
  0xd5   : > { %1716 = vmatpush1.bf16.msra.mxu1 %v2460_v20  ;;  %1674 = vmatprep.subr.bf16.mxu0 %v2465_v21 }
  0xd6   : > { %1717 = vmatprep.subr.bf16.mxu1 %v2468_v22 }
  0xd8   : > { %1675 = vmatpush1.bf16.msra.mxu0 %v2463_v23 }
  0xd9   : > { %1718 = vmatpush1.bf16.msra.mxu1 %v2466_v24  ;;  %1676 = vmatprep.subr.bf16.mxu0 %v2471_v25 }
  0xda   : > { %1719 = vmatprep.subr.bf16.mxu1 %v2474_v26 }
  0xdc   : > { %1677 = vmatpush1.bf16.msra.mxu0 %v2469_v27 }
  0xdd   : > { %1720 = vmatpush1.bf16.msra.mxu1 %v2472_v28  ;;  %1678 = vmatprep.subr.bf16.mxu0 %v2477_v29 }
  0xde   : > { %1721 = vmatprep.subr.bf16.mxu1 %v2480_v30 }
  0xe0   : > { %1679 = vmatpush1.bf16.msra.mxu0 %v2475_v31 }
  0xe1   : > { %1722 = vmatpush1.bf16.msra.mxu1 %v2478_v32  ;;  %1680 = vmatprep.subr.bf16.mxu0 %v2483_v33 }
  0xe2   : > { %1723 = vmatprep.subr.bf16.mxu1 %v2486_v34 }
  0xe4   : > { %1681 = vmatpush1.bf16.msra.mxu0 %v2481_v35 }
  0xe5   : > { %1724 = vmatpush1.bf16.msra.mxu1 %v2484_v36  ;;  %1682 = vmatprep.subr.bf16.mxu0 %v2489_v37 }
  0xe6   : > { %1725 = vmatprep.subr.bf16.mxu1 %v2492_v38 }
  0xe8   : > { %1683 = vmatpush2.bf16.msra.mxu0 %v2487_v39 }
  0xe9   : > { %1726 = vmatpush2.bf16.msra.mxu1 %v2490_v40  ;;  %1684 = vmatprep.subr.bf16.mxu0 %v2495_v41 }
  0xea   : > { %1727 = vmatprep.subr.bf16.mxu1 %v2498_v42 }
  0xec   : > { %1685 = vmatpush2.bf16.msra.mxu0 %v2493_v43 }
  0xed   : > { %1728 = vmatpush2.bf16.msra.mxu1 %v2496_v44  ;;  %1686 = vmatprep.subr.bf16.mxu0 %v2501_v45 }
  0xee   : > { %1729 = vmatprep.subr.bf16.mxu1 %v2504_v46 }
  0xf0   : > { %1687 = vmatpush2.bf16.msra.mxu0 %v2499_v47 }
  0xf1   : > { %1730 = vmatpush2.bf16.msra.mxu1 %v2502_v48  ;;  %1688 = vmatprep.subr.bf16.mxu0 %v2507_v49 }
  0xf2   : > { %1731 = vmatprep.subr.bf16.mxu1 %v2510_v50 }
  0xf4   : > { %1689 = vmatpush2.bf16.msra.mxu0 %v2505_v51 }
  0xf5   : > { %1732 = vmatpush2.bf16.msra.mxu1 %v2508_v52  ;;  %1690 = vmatprep.subr.bf16.mxu0 %v2513_v53 }
  0xf6   : > { %1733 = vmatprep.subr.bf16.mxu1 %v2516_v54 }
  0xf8   : > { %1691 = vmatpush2.bf16.msra.mxu0 %v2511_v55  ;;  %v275_v55 = vld [vmem:[#allocation7] sm:$0xff] }
  0xf9   : > { %1734 = vmatpush2.bf16.msra.mxu1 %v2514_v56  ;;  %1692 = vmatprep.subr.bf16.mxu0 %v2519_v57  ;;  %v277_v56 = vld [vmem:[#allocation7 + $0x10] sm:$0xff] }
  0xfa   : > { %1735 = vmatprep.subr.bf16.mxu1 %v2522_v58 }
  0xfc   : > { %1693 = vmatpush2.bf16.msra.mxu0 %v2517_v59  ;;  %v276_v59 = vld [vmem:[#allocation7 + $0x8] sm:$0xff] }
  0xfd   : > { %1736 = vmatpush2.bf16.msra.mxu1 %v2520_v60  ;;  %1694 = vmatprep.subr.bf16.mxu0 %v2525_v61  ;;  %v278_v60 = vld [vmem:[#allocation7 + $0x18] sm:$0xff] }
  0xfe   : > { %1737 = vmatprep.subr.bf16.mxu1 %v2528_v62 }
 0x100   : > { %1695 = vmatpush2.bf16.msra.mxu0 %v2523_v63 }
 0x101   : > { %1738 = vmatpush2.bf16.msra.mxu1 %v2526_v0  ;;  %1696 = vmatprep.subr.bf16.mxu0 %v2531_v1  ;;  %v279_v1 = vld [vmem:[#allocation7 + $0x20] sm:$0xff] }
 0x102   : > { %1739 = vmatprep.subr.bf16.mxu1 %v2534_v2  ;;  %v281_v2 = vld [vmem:[#allocation7 + $0x30] sm:$0xff] }
 0x104   : > { %1697 = vmatpush2.bf16.msra.mxu0 %v2529_v3 }
 0x105   : > { %1740 = vmatpush2.bf16.msra.mxu1 %v2532_v4 }
 0x147   : > { %v725_v7 = vpop.f32.mrf.mxu0 }
 0x148   : > { %v768_v8 = vpop.f32.mrf.mxu1 }
 0x149   : > { %v727_v9 = vpop.f32.mrf.mxu0  ;;  %v769_v16 = vadd.f32 %v768_v8, %v725_v7 }
 0x14a   : > { %v770_v10 = vpop.f32.mrf.mxu1 }
 0x14b   : > { %v729_v11 = vpop.f32.mrf.mxu0  ;;  %v771_v6 = vadd.f32 %v770_v10, %v727_v9  ;;  %v2091_v20 = vmul.f32 -1.442695, %v769_v16  ;;  %v280_v9 = vld [vmem:[#allocation7 + $0x28] sm:$0xff]  ;;  %v282_v10 = vld [vmem:[#allocation7 + $0x38] sm:$0xff] }
 0x14c   : > { %v772_v12 = vpop.f32.mrf.mxu1 }
 0x14d   : > { %v731_v13 = vpop.f32.mrf.mxu0  ;;  %v773_v14 = vadd.f32 %v772_v12, %v729_v11  ;;  %v2092_v17 = vmul.f32 -1.442695, %v771_v6 }
 0x14e   : > { %v774_v5 = vpop.f32.mrf.mxu1 }
 0x14f   : > { %v775_v15 = vadd.f32 %v774_v5, %v731_v13  ;;  %v2093_v18 = vmul.f32 -1.442695, %v773_v14  ;;  %2535 = vpow2.f32 %v2092_v17 }
 0x151   : > { %v2094_v19 = vmul.f32 -1.442695, %v775_v15  ;;  %2537 = vpow2.f32 %v2093_v18 }
 0x153   : > { %2539 = vpow2.f32 %v2094_v19 }
 0x154   : > { %2541 = vpow2.f32 %v2091_v20 }
 0x15c   : > { %v2536_v21 = vpop.eup %2535 }
 0x15d   : > { %v1261_v25 = vadd.f32 1.0, %v2536_v21 }
 0x15e   : > { %v2538_v22 = vpop.eup %2537 }
 0x15f   : > { %v1262_v26 = vadd.f32 1.0, %v2538_v22  ;;  %2543 = vrcp.f32 %v1261_v25 }
 0x160   : > { %v2540_v23 = vpop.eup %2539 }
 0x161   : > { %v2542_v24 = vpop.eup %2541  ;;  %v1263_v27 = vadd.f32 1.0, %v2540_v23  ;;  %2545 = vrcp.f32 %v1262_v26 }
 0x162   : > { %v1260_v28 = vadd.f32 1.0, %v2542_v24 }
 0x163   : > { %2547 = vrcp.f32 %v1263_v27 }
 0x164   : > { %2549 = vrcp.f32 %v1260_v28 }
 0x16c   : > { %v2544_v31 = vpop.eup %2543 }
 0x16d   : > { %v1273_v45 = vmul.f32 %v2544_v31, %v771_v6 }
 0x16e   : > { %v2546_v34 = vpop.eup %2545 }
 0x16f   : > { %v1274_v41 = vmul.f32 %v2546_v34, %v773_v14 }
 0x170   : > { %v2548_v35 = vpop.eup %2547 }
 0x171   : > { %v2550_v38 = vpop.eup %2549  ;;  %v1275_v46 = vmul.f32 %v2548_v35, %v775_v15 }
 0x172   : > { %v1272_v48 = vmul.f32 %v2550_v38, %v769_v16 }
 0x187   : > { %v1196_v29 = vpop.f32.mrf.mxu0 }
 0x188   : > { %v1239_v30 = vpop.f32.mrf.mxu1 }
 0x189   : > { %v1198_v32 = vpop.f32.mrf.mxu0  ;;  %v1240_v42 = vadd.f32 %v1239_v30, %v1196_v29 }
 0x18a   : > { %v1241_v33 = vpop.f32.mrf.mxu1 }
 0x18b   : > { %v1200_v36 = vpop.f32.mrf.mxu0  ;;  %v1242_v39 = vadd.f32 %v1241_v33, %v1198_v32  ;;  %v1276_v52 = vmul.f32 %v1272_v48, %v1240_v42 }
 0x18c   : > { %v1243_v37 = vpop.f32.mrf.mxu1 }
 0x18d   : > { %v1244_v40 = vadd.f32 %v1243_v37, %v1200_v36  ;;  %v1202_v43 = vpop.f32.mrf.mxu0  ;;  %v1277_v50 = vmul.f32 %v1273_v45, %v1242_v39 }
 0x18e   : > { %v1245_v44 = vpop.f32.mrf.mxu1 }
 0x18f   : > { %v1246_v47 = vadd.f32 %v1245_v44, %v1202_v43  ;;  %v1278_v49 = vmul.f32 %v1274_v41, %v1244_v40 }
 0x191   : > { %v1279_v51 = vmul.f32 %v1275_v46, %v1246_v47  ;;  %v1280_v54 = vpack.c.bf16 %v1278_v49, %v1276_v52 }
 0x193   : > { %v1281_v53 = vpack.c.bf16 %v1279_v51, %v1277_v50 }
 0x195   : > { %1698 = vmatprep.mubr.bf16.mxu0 %v1281_v53  ;;  %1741 = vmatprep.mubr.bf16.mxu1 %v1281_v53 }
 0x196   : > { %1699 = vmatmul.mubr.bf16.vlgmr.msra.gmra.mxu0 %v1280_v54  ;;  %1742 = vmatmul.mubr.bf16.vlgmr.msra.gmra.mxu1 %v1280_v54 }
 0x256   : > { %v1700_v57 = vpop.f32.mrf.mxu0  ;;  %v1743_v58 = vpop.f32.mrf.mxu1 }
 0x257   : > { %v1752_v61 = vadd.f32 %v1700_v57, %v275_v55  ;;  %v1754_v62 = vadd.f32 %v1743_v58, %v277_v56 }
 0x258   : > { %v1702_v63 = vpop.f32.mrf.mxu0  ;;  %v1745_v0 = vpop.f32.mrf.mxu1 }
 0x259   : > { %1760 = vst [vmem:[#allocation7] sm:$0xff] %v1752_v61  ;;  %1762 = vst [vmem:[#allocation7 + $0x10] sm:$0xff] %v1754_v62  ;;  %v1753_v3 = vadd.f32 %v1702_v63, %v276_v59  ;;  %v1755_v4 = vadd.f32 %v1745_v0, %v278_v60 }
 0x25a   : > { %v1704_v7 = vpop.f32.mrf.mxu0  ;;  %v1747_v8 = vpop.f32.mrf.mxu1 }
 0x25b   : > { %1761 = vst [vmem:[#allocation7 + $0x8] sm:$0xff] %v1753_v3  ;;  %1763 = vst [vmem:[#allocation7 + $0x18] sm:$0xff] %v1755_v4  ;;  %v1756_v11 = vadd.f32 %v1704_v7, %v279_v1  ;;  %v1758_v12 = vadd.f32 %v1747_v8, %v281_v2 }
 0x25c   : > { %v1706_v13 = vpop.f32.mrf.mxu0  ;;  %v1749_v5 = vpop.f32.mrf.mxu1 }
 0x25d   : > { %1764 = vst [vmem:[#allocation7 + $0x20] sm:$0xff] %v1756_v11  ;;  %1766 = vst [vmem:[#allocation7 + $0x30] sm:$0xff] %v1758_v12  ;;  %v1757_v6 = vadd.f32 %v1706_v13, %v280_v9  ;;  %v1759_v14 = vadd.f32 %v1749_v5, %v282_v10 }
 0x25f   : > { %1765 = vst [vmem:[#allocation7 + $0x28] sm:$0xff] %v1757_v6  ;;  %1767 = vst [vmem:[#allocation7 + $0x38] sm:$0xff] %v1759_v14 }
 0x260   : > { %2620 = shalt.err (!%p2617_p12)
}
 0x261   : > { %s2700_s18 = smov 512   ;;  %s2701_s20 = smov 32  }
 0x262   : > { %2171 = dma.vmem_to_hbm [thread:$0]  (%p3046_p7), %s1779_s5, 1024, %s3082_s3, [#allocation4], %s2700_s18, %s2700_s18, %s2701_s20  }
 0x263   : > { %2664 = dma.done.wait (%p3046_p7), [#allocation4], 1024  }
 0x264   : > { %2666 = vsyncadd (%p3046_p7), [#allocation4], 4294966272 }
 0x265 PF: > { %s20_s17 = sadd.s32 1, %s2689_s17   ;;  %s3088_s12 = smov %s2673_s13 }
 0x266   : > { %p17_p13 = scmp.ge.s32.totalorder %s20_s17, 8   ;;  %s3089_s13 = smov %s2677_s14 }
 0x267   : > { %s3090_s14 = smov %s2773_s24  ;;  %s3091_s15 = smov %s2685_s16 }
 0x268   : > { %s3092_s16 = smov %s3094_s19  ;;  %19 = sbr.rel (!%p17_p13) target bundleno = 7 (0x7), region = 91 }
 0x26d   :  { %1794 = vsyncpa [#allocation3], 1 }
 0x26e   :  { %1796 = vsyncpa [#allocation3 + $0x1], 1 }
 0x26f   :  { %1797 = vsyncpa [#allocation6], 1 }
 0x270   :  { %1799 = vsyncpa [#allocation6 + $0x1], 1 }
 0x271   :  { %1800 = vsyncpa [#allocation4], 1 }
 0x272   :  { %1802 = vsyncpa [#allocation4 + $0x1], 1 }

</bundles_post_ra>
